<compile_context>
chip_gen: v6e
topology: v6e:2x2x1
jax: 0.10.0
libtpu: 0.0.40
codegen_flags: <defaults>
</compile_context>

<pallas_src>
from functools import partial
import math

import jax
import jax.numpy as jnp
from jax.experimental import pallas as pl
from jax.experimental.pallas import tpu as pltpu


def _sinusoidal_kernel(x_ref, freq_ref, phase_ref, out_ref):
    """x_ref: (bn, 1) f32, freq_ref/phase_ref: (1, size) f32, out_ref: (bn, size)."""
    # angle = x * (freq * scale) + phase ; sin covers both halves (cos = sin(.+pi/2))
    ang = x_ref[...] * freq_ref[...] + phase_ref[...]          # (bn, size) VPU
    out_ref[...] = jnp.sin(ang).astype(out_ref.dtype)          # EUP sweep, lane-dense vst


def _round_up(v, m):
    return ((v + m - 1) // m) * m


def sinusoidal_embedding(x, size, scale=1.0, block_n=1024, out_dtype=jnp.float32):
    """x: (N,) float -> (N, size) out_dtype, matching the PyTorch module forward.

    Pass out_dtype=jnp.bfloat16 if the consumer accepts it (halves HBM writeback).
    """
    assert x.ndim == 1, "SinusoidalEmbedding expects a 1-D input of scalars"
    assert size % 2 == 0 and size >= 4
    n = x.shape[0]
    half = size // 2

    # ---- host-side tables: scale folded into freqs, pi/2 phase selects cos lanes
    log_ratio = math.log(10000.0) / (half - 1)
    freqs = jnp.exp(-log_ratio * jnp.arange(half, dtype=jnp.float32)) * jnp.float32(scale)
    freqs_full = jnp.concatenate([freqs, freqs]).reshape(1, size)
    phase = jnp.concatenate(
        [jnp.zeros((half,), jnp.float32),
         jnp.full((half,), math.pi / 2.0, jnp.float32)]
    ).reshape(1, size)

    # ---- row-tile selection
    # VMEM budget for the per-step double-buffered tiles:
    #   2 * (bn, size) f32 output buffers + 2 * (bn, 128) lane-padded x buffers
    budget_bytes = 24 * 1024 * 1024            # conservative for v7x (64 MiB physical)
    bytes_per_row = 2 * size * 4 + 2 * 128 * 4
    cap = max(8, (budget_bytes // bytes_per_row) // 8 * 8)

    if n <= block_n:
        if n >= 16:
            # >= 2 grid steps so the "parallel" axis can shard across v7x's 2 TCs
            bn = _round_up(pl.cdiv(n, 2), 8)
        else:
            bn = 8
    else:
        bn = block_n if n < (1 << 20) else 2 * block_n   # bigger tiles for huge N
    bn = max(8, (min(bn, cap) // 8) * 8)

    grid = (pl.cdiv(n, bn),)                   # ragged last block: no pad, no slice
    x2 = x.astype(jnp.float32).reshape(n, 1)

    out = pl.pallas_call(
        _sinusoidal_kernel,
        out_shape=jax.ShapeDtypeStruct((n, size), out_dtype),
        grid=grid,
        in_specs=[
            pl.BlockSpec((bn, 1), lambda i: (i, 0)),        # row tile of inputs
            pl.BlockSpec((1, size), lambda i: (0, 0)),      # scaled freqs, replicated
            pl.BlockSpec((1, size), lambda i: (0, 0)),      # phase row, replicated
        ],
        out_specs=pl.BlockSpec((bn, size), lambda i: (i, 0)),
        compiler_params=pltpu.CompilerParams(
            dimension_semantics=("parallel",),
            vmem_limit_bytes=32 * 1024 * 1024,   # scoped default-compatible on v5e/v6e/v7x
        ),
    )(x2, freqs_full, phase)

    return out


def reference_forward(x, size, scale=1.0):
    """Plain-JAX mirror of the PyTorch forward (source of truth)."""
    xs = x.astype(jnp.float32) * scale
    half = size // 2
    log_ratio = math.log(10000.0) / (half - 1)
    emb = jnp.exp(-log_ratio * jnp.arange(half, dtype=jnp.float32))
    ang = xs[:, None] * emb[None, :]
    return jnp.concatenate([jnp.sin(ang), jnp.cos(ang)], axis=-1)


if __name__ == "__main__":
    key = jax.random.PRNGKey(0)

    N = 10        # not a multiple of the 8-row tile -> exercises the ragged last block
    SIZE = 128    # 64 sin lanes + 64 cos lanes, lane-dense output
    SCALE = 25.0

    x = jax.random.uniform(key, (N,), jnp.float32, minval=0.0, maxval=1.0)

    out = sinusoidal_embedding(x, SIZE, scale=SCALE)
    out = jax.block_until_ready(out)

    ref = reference_forward(x, SIZE, scale=SCALE)
    assert out.shape == (N, SIZE), out.shape
    # sin(a + pi/2) vs cos(a) and scale-folding reorder differ by a few ulp only
    max_err = float(jnp.max(jnp.abs(out - ref)))
    assert max_err < 5e-5, max_err
    print("KERNEL_OK")
</pallas_src>

<mosaic_0001>
module attributes {stable_mosaic.version = 11 : i64} {
  func.func @_sinusoidal_kernel(%arg0: i32, %arg1: memref<8x1xf32, #tpu.memory_space<vmem>>, %arg2: memref<1x128xf32, #tpu.memory_space<vmem>>, %arg3: memref<1x128xf32, #tpu.memory_space<vmem>>, %arg4: memref<8x128xf32, #tpu.memory_space<vmem>>) attributes {dimension_semantics = [#tpu.dimension_semantics<parallel>], iteration_bounds = array<i64: 2>, scalar_prefetch = 0 : i64, scratch_operands = 0 : i64, tpu.core_type = #tpu.core_type<tc>, window_params = [{transform_indices = @transform_0, window_bounds = array<i64: 8, 1>}, {pipeline_mode = #tpu.pipeline_mode<synchronous>, transform_indices = @transform_1, window_bounds = array<i64: 1, 128>}, {pipeline_mode = #tpu.pipeline_mode<synchronous>, transform_indices = @transform_2, window_bounds = array<i64: 1, 128>}, {transform_indices = @transform_3, window_bounds = array<i64: 8, 128>}]} {
    %c0 = arith.constant 0 : index
    %c0_0 = arith.constant 0 : index
    %0 = vector.load %arg1[%c0, %c0_0] : memref<8x1xf32, #tpu.memory_space<vmem>>, vector<8x1xf32>
    %c0_1 = arith.constant 0 : index
    %c0_2 = arith.constant 0 : index
    %1 = vector.load %arg2[%c0_1, %c0_2] : memref<1x128xf32, #tpu.memory_space<vmem>>, vector<1x128xf32>
    %2 = vector.broadcast %0 : vector<8x1xf32> to vector<8x128xf32>
    %3 = vector.broadcast %1 : vector<1x128xf32> to vector<8x128xf32>
    %4 = arith.mulf %2, %3 : vector<8x128xf32>
    %c0_3 = arith.constant 0 : index
    %c0_4 = arith.constant 0 : index
    %5 = vector.load %arg3[%c0_3, %c0_4] : memref<1x128xf32, #tpu.memory_space<vmem>>, vector<1x128xf32>
    %6 = vector.broadcast %5 : vector<1x128xf32> to vector<8x128xf32>
    %7 = arith.addf %4, %6 : vector<8x128xf32>
    %8 = math.sin %7 : vector<8x128xf32>
    %c0_5 = arith.constant 0 : index
    %c0_6 = arith.constant 0 : index
    %9 = vector.load %arg4[%c0_5, %c0_6] : memref<8x128xf32, #tpu.memory_space<vmem>>, vector<8x128xf32>
    tpu.vector_store %arg4[%c0_5, %c0_6], %8 {strides = array<i32>} : memref<8x128xf32, #tpu.memory_space<vmem>>, vector<8x128xf32>,
    return
  }
  func.func @transform_0(%arg0: i32) -> (i32, i32) {
    %c0_i32 = arith.constant 0 : i32
    %c0_i32_0 = arith.constant 0 : i32
    return %arg0, %c0_i32 : i32, i32
  }
  func.func @transform_1(%arg0: i32) -> (i32, i32) {
    %c0_i32 = arith.constant 0 : i32
    %c0_i32_0 = arith.constant 0 : i32
    %c0_i32_1 = arith.constant 0 : i32
    return %c0_i32, %c0_i32_0 : i32, i32
  }
  func.func @transform_2(%arg0: i32) -> (i32, i32) {
    %c0_i32 = arith.constant 0 : i32
    %c0_i32_0 = arith.constant 0 : i32
    %c0_i32_1 = arith.constant 0 : i32
    return %c0_i32, %c0_i32_0 : i32, i32
  }
  func.func @transform_3(%arg0: i32) -> (i32, i32) {
    %c0_i32 = arith.constant 0 : i32
    %c0_i32_0 = arith.constant 0 : i32
    return %arg0, %c0_i32 : i32, i32
  }
}

</mosaic_0001>

<bundles_post_ra>
// kernel: tpu_custom_call.1
= control target key start
LH: loop header
LB: loop body
LE: loop exit
PB: predicated region body
PF: predicated region fallthrough
CT: control target
= control target key end

     0   :  { %8 = vsyncpa [#allocation3], 0  ;;  %s647_s0 = inlined_call_operand.vmem [shape: f32[10,1], index: 0, kind: input, shape index: {}]   ;;  %s648_s1 = inlined_call_operand.vmem [shape: f32[1,128], index: 1, kind: input, shape index: {}]   ;;  %s649_s2 = inlined_call_operand.vmem [shape: f32[1,128], index: 2, kind: input, shape index: {}]   ;;  %s650_s3 = inlined_call_operand.hbm [shape: f32[10,128], index: 3, kind: output, shape index: {}]  }
   0x1   :  { %10 = vsyncpa [#allocation3 + $0x1], 0  ;;  %s527_s12 = smov 0   ;;  %s529_s13 = smov 0  }
   0x2   :  { %s531_s14 = smov 0   ;;  %s533_s15 = smov 0  }
   0x3 LB: > { %s548_s16 = sadd.s32 4294967295, %s497_s15   ;;  %s366_s17 = sadd.s32 4294967294, %s497_s15   ;;  %s497_s15 = sphi %s533_s15, %s656_s15   ;;  %s493_s14 = sphi %s531_s14, %s655_s14   ;;  %s489_s13 = sphi %s529_s13, %s654_s13   ;;  %s485_s12 = sphi %s527_s12, %s653_s12  }
   0x4   : > { %s552_s18 = sadd.s32 1, %s497_s15   ;;  %s91_s19 = sadd.s32 1, %s493_s14 }
   0x5   : > { %s88_s20 = ssub.s32 %s497_s15, %s552_s18  ;;  %p101_p0 = scmp.ne.s32.totalorder %s493_s14, %s489_s13 }
   0x6   : > { %p89_p1 = scmp.eq.s32.totalorder %s88_s20, 0  ;;  %p102_p2 = scmp.eq.s32.totalorder %s548_s16, 1 }
   0x7   : > { %p107_p3 = scmp.ne.s32.totalorder %s489_s13, %s485_s12  ;;  %p108_p4 = scmp.eq.s32.totalorder %s366_s17, 1 }
   0x8   : > { %s563_s21 = scalar_select %p89_p1, %s493_s14, %s91_s19  }
   0x9   : > { %p565_p5 = por %p102_p2, %p101_p0  ;;  %p569_p6 = por %p108_p4, %p107_p3 }
   0xa   : > { %p369_p7 = scmp.ge.s32.totalorder %s497_s15, 1  ;;  %p139_p8 = scmp.lt.s32.totalorder %s497_s15, 3 }
   0xc   : > { %p140_p9 = pnand %p369_p7, %p139_p8 }
   0xd   : > { %p162_p10 = scmp.lt.s32.totalorder (!%p140_p9), %s548_s16, 1  ;;  %s159_s6 = sand.u32 (!%p140_p9), 1, %s489_s13  }
   0xe   : > { %143 = sbr.rel (%p140_p9) target bundleno = 247 (0xf7), region = 32  ;;  %s370_s7 = sshll.u32 (!%p140_p9), %s159_s6, 3 }
   0xf   : > { %s379_s8 = sshll.u32 (!%p140_p9), %s548_s16, 7  ;;  %s161_s9 = scalar_lea.vmem (!%p140_p9), [#allocation2], %s370_s7 }
  0x10   : > { %s307_s10 = sshll.u32 (!%p140_p9), %s161_s9, 4  ;;  %s612_s19 = scalar_lea.hbm (!%p140_p9), %s650_s3, %s379_s8  ;;  %s308_s10 = int_to_ptr.vmem [resolvable:$true] %s307_s10 }
  0x11   : > { %s294_s20 = scalar_lea.sflag (!%p140_p9), [#allocation3], %s159_s6 }
  0x13   : > { %v499_v0 = vmov 0   ;;  %s163_s24 = scalar_select %p162_p10, %s548_s16, 1  ;;  %v372_v2 = vld [vmem:[%s648_s1] ss:$0 sm:$0xff]  ;;  %v500_v17 = vmov 683565275  }
  0x14   : > { %432 = vset.pattern.permute.xlu0 %v499_v0  ;;  %v373_v3 = vld [vmem:[%s649_s2] ss:$0 sm:$0xff]  ;;  %v501_v19 = vmov 2475754826   ;;  %v502_v22 = vmov 2131351028  }
  0x15   : > { %s371_s25 = sshll.u32 %s163_s24, 3  ;;  %v503_v25 = vmov 2102212464   ;;  %v504_v28 = vmov 920167782   ;;  %s437_s16 = scalar_lea.vmem %s308_s10, 128 }
  0x16   : > { %s165_s28 = scalar_lea.vmem %s647_s0, %s371_s25  ;;  %v505_v31 = vmov 1326507024   ;;  %p438_p11 = scmp.ne.s32.totalorder %s308_s10, %s437_s16 }
  0x17   : > { %v166_v1 = vld [vmem:[%s165_s28] sm:$0xff]  ;;  %s506_s24 = smov [#allocation2]  }
  0x18   : > { %170 = vperm.xlu0 %432, %v166_v1   ;;  %p439_p12 = pnand %p438_p11, %p565_p5  ;;  %s441_s25 = sshll.u32 %s506_s24, 4  ;;  %s442_s25 = int_to_ptr.vmem [resolvable:$false] %s441_s25 }
  0x19   : > { %s443_s26 = scalar_lea.vmem %s442_s25, 256  ;;  %p444_p0 = scmp.lt.s32.totalorder %s308_s10, %s442_s25 }
  0x1a   : > { %p440_p13 = pneg %p439_p12  ;;  %p445_p1 = scmp.lt.s32.totalorder %s443_s26, %s437_s16 }
  0x1c   : > { %p446_p2 = por %p445_p1, %p444_p0 }
  0x1e   : > { %p447_p3 = pnand %p446_p2, %p440_p13 }
  0x93   : > { %v171_v4 = vpop.permute.xlu0 %170 }
  0x94   : > { %v179_v5 = vmul.f32 %v372_v2, %v171_v4 }
  0x96   : > { %v586_v6 = vadd.f32 %v373_v3, %v179_v5 }
  0x98   : > { %v191_v7 = vand.u32 2139095040, %v586_v6  ;;  %v188_v11 = vand.u32 2147483647, %v586_v6  ;;  %vm190_vm7 = vcmp.lt.s32.totalorder %v586_v6, 0  ;;  %vm280_vm12 = vweird.f32 %v586_v6 }
  0x9a   : > { %v192_v8 = vshrl.u32 %v191_v7, 23  ;;  %v195_v14 = vand.u32 8388607, %v188_v11  ;;  %vm189_vm8 = vcmp.le.f32.partialorder %v188_v11, 0.7853982 }
  0x9c   : > { %v374_v9 = vadd.s32 4294967169, %v192_v8  ;;  %v196_v33 = vor.u32 8388608, %v195_v14 }
  0x9e   : > { %v198_v10 = vadd.s32 1, %v374_v9  ;;  %v236_v47 = vshll.u32 %v196_v33, 8 }
  0xa0   : > { %vm199_vm0 = vcmp.gt.s32.totalorder %v198_v10, 0 }
  0xa1   : > { %v200_v12 = vsel %vm199_vm0, %v198_v10, 0 }
  0xa2   : > { %v202_v13 = vand.u32 31, %v200_v12  ;;  %v201_v16 = vshrl.u32 %v200_v12, 5 }
  0xa4   : > { %v203_v15 = vsub.s32 32, %v202_v13  ;;  %v205_v18 = vshll.u32 %v500_v17, %v202_v13  ;;  %v208_v20 = vshll.u32 %v501_v19, %v202_v13  ;;  %v211_v24 = vshll.u32 %v502_v22, %v202_v13 }
  0xa5   : > { %v214_v27 = vshll.u32 %v503_v25, %v202_v13  ;;  %v217_v30 = vshll.u32 %v504_v28, %v202_v13  ;;  %vm220_vm1 = vcmp.lt.s32.totalorder %v201_v16, 1  ;;  %vm223_vm2 = vcmp.lt.s32.totalorder %v201_v16, 4 }
  0xa6   : > { %v206_v21 = vshrl.u32 %v501_v19, %v203_v15  ;;  %v209_v23 = vshrl.u32 %v502_v22, %v203_v15  ;;  %v212_v26 = vshrl.u32 %v503_v25, %v203_v15  ;;  %v215_v29 = vshrl.u32 %v504_v28, %v203_v15 }
  0xa7   : > { %v218_v32 = vshrl.u32 %v505_v31, %v203_v15  ;;  %v204_v42 = vshrl.u32 %v500_v17, %v203_v15  ;;  %vm222_vm3 = vcmp.lt.s32.totalorder %v201_v16, 3  ;;  %vm221_vm4 = vcmp.lt.s32.totalorder %v201_v16, 2 }
  0xa8   : > { %v207_v34 = vor.u32 %v206_v21, %v205_v18  ;;  %v210_v35 = vor.u32 %v209_v23, %v208_v20  ;;  %v213_v36 = vor.u32 %v212_v26, %v211_v24  ;;  %v216_v37 = vor.u32 %v215_v29, %v214_v27 }
  0xa9   : > { %v219_v38 = vor.u32 %v218_v32, %v217_v30 }
  0xaa   : > { %v225_v39 = vsel %vm223_vm2, %v213_v36, 2102212464  ;;  %v228_v40 = vsel %vm220_vm1, %v207_v34, %v210_v35  ;;  %v232_v41 = vsel %vm220_vm1, %v210_v35, %v213_v36  ;;  %v229_v43 = vsel %vm223_vm2, %v216_v37, 920167782 }
  0xab   : > { %v233_v44 = vsel %vm223_vm2, %v219_v38, 1326507024  ;;  %v230_v45 = vsel %vm222_vm3, %v213_v36, %v229_v43  ;;  %v224_v48 = vsel %vm220_vm1, %v204_v42, %v207_v34  ;;  %v226_v49 = vsel %vm222_vm3, %v210_v35, %v225_v39 }
  0xac   : > { %v234_v46 = vsel %vm222_vm3, %v216_v37, %v233_v44  ;;  %v231_v50 = vsel %vm221_vm4, %v228_v40, %v230_v45  ;;  %v227_v56 = vsel %vm221_vm4, %v224_v48, %v226_v49 }
  0xad   : > { %v235_v51 = vsel %vm221_vm4, %v232_v41, %v234_v46  ;;  %v595_v54 = vmul.u32.u64.low %v236_v47, %v231_v50  ;;  %v596_v55 = vmul.u32.u64.high %v236_v47, %v231_v50, %v595_v54  ;;  %v243_v58 = vmul.u32 %v236_v47, %v227_v56 }
  0xae   : > { %v592_v52 = vmul.u32.u64.low %v236_v47, %v235_v51  ;;  %v593_v53 = vmul.u32.u64.high %v236_v47, %v235_v51, %v592_v52 }
  0xaf   : > { %v246_v57 = vadd.s32 1, %v596_v55 }
  0xb0   : > { %vm245_vm5 = vc.u32 %v593_v53, %v595_v54  ;;  %v244_v7 = vadd.s32 %v595_v54, %v593_v53 }
  0xb1   : > { %v247_v59 = vsel %vm245_vm5, %v246_v57, %v596_v55 }
  0xb2   : > { %v248_v60 = vadd.s32 %v247_v59, %v243_v58 }
  0xb4   : > { %v249_v61 = vadd.s32 536870912, %v248_v60 }
  0xb6   : > { %v250_v62 = vshrl.u32 %v249_v61, 30 }
  0xb8   : > { %v251_v63 = vshll.u32 %v250_v62, 30  ;;  %v274_v21 = vsub.s32 4, %v250_v62 }
  0xba   : > { %v252_v0 = vsub.s32 %v248_v60, %v251_v63  ;;  %v275_v24 = vsel %vm190_vm7, %v274_v21, %v250_v62 }
  0xbb   : > { %v277_v25 = vsel %vm189_vm8, 0, %v275_v24 }
  0xbc   : > { %v254_v1 = vsub.s32 0, %v252_v0  ;;  %v281_v26 = vadd.s32 3, %v277_v25 }
  0xbe   : > { %v375_v2 = vmin.u32 %v254_v1, %v252_v0  ;;  %v282_v27 = vand.u32 3, %v281_v26 }
  0xc0   : > { %v256_v3 = vclz %v375_v2  ;;  %vm287_vm9 = vcmp.eq.s32.totalorder %v282_v27, 2  ;;  %vm284_vm10 = vcmp.eq.s32.totalorder %v282_v27, 0  ;;  %vm283_vm11 = vcmp.lt.s32.totalorder %v282_v27, 2 }
  0xc2   : > { %v376_v4 = vadd.s32 4294967294, %v256_v3 }
  0xc4   : > { %vm377_vm6 = vcmp.lt.s32.totalorder %v376_v4, 0 }
  0xc5   : > { %v259_v5 = vsel %vm377_vm6, 0, %v376_v4 }
  0xc6   : > { %v260_v8 = vsub.s32 32, %v259_v5  ;;  %v264_v9 = vsub.s32 4294967266, %v259_v5  ;;  %v261_v10 = vshll.u32 %v252_v0, %v259_v5 }
  0xc8   : > { %v262_v12 = vshrl.u32 %v244_v7, %v260_v8  ;;  %v265_v13 = vadd.s32 127, %v264_v9 }
  0xca   : > { %v263_v14 = vor.u32 %v262_v12, %v261_v10  ;;  %v266_v15 = vshll.u32 %v265_v13, 23 }
  0xcc   : > { %v267_v16 = vor.u32 4788187, %v266_v15  ;;  %v270_v18 = vcvt.s32.f32 %v263_v14 }
  0xce   : > { %v268_v17 = vand.u32 2147483647, %v267_v16 }
  0xd0   : > { %v271_v19 = vmul.f32 %v270_v18, %v268_v17 }
  0xd2   : > { %v272_v20 = vxor.u32 2147483648, %v271_v19 }
  0xd4   : > { %v273_v22 = vsel %vm190_vm7, %v272_v20, %v271_v19 }
  0xd5   : > { %v276_v23 = vsel %vm189_vm8, %v586_v6, %v273_v22 }
  0xd6   : > { %433 = vcosq.f32 %v276_v23 }
  0xd7   : > { %435 = vsinq.f32 %v276_v23 }
  0xe3   : > { %v434_v28 = vpop.eup %433 }
  0xe4   : > { %v436_v29 = vpop.eup %435  ;;  %v288_v30 = vxor.u32 2147483648, %v434_v28 }
  0xe5   : > { %v285_v31 = vxor.u32 2147483648, %v436_v29 }
  0xe6   : > { %v289_v11 = vsel %vm287_vm9, %v288_v30, %v436_v29 }
  0xe7   : > { %v286_v32 = vsel %vm284_vm10, %v434_v28, %v285_v31 }
  0xe8   : > { %v290_v33 = vsel %vm283_vm11, %v286_v32, %v289_v11 }
  0xe9   : > { %v291_v34 = vsel %vm280_vm12, nan, %v290_v33 }
  0xea   : > { %292 = vst [vmem:[%s161_s9] sm:$0xff] %v291_v34 }
  0xeb   : > { %450 = shalt.err (!%p447_p3)
}
  0xec   : > { %s451_s27 = scalar_lea.hbm %s612_s19, 128  ;;  %s455_s30 = scalar_lea.hbm %s650_s3, 256 }
  0xed   : > { %p452_p4 = scmp.ne.s32.totalorder %s612_s19, %s451_s27  ;;  %p456_p9 = scmp.lt.s32.totalorder %s612_s19, %s650_s3 }
  0xee   : > { %p457_p10 = scmp.lt.s32.totalorder %s455_s30, %s451_s27 }
  0xef   : > { %p453_p7 = pnand %p452_p4, %p565_p5 }
  0xf0   : > { %p458_p11 = por %p457_p10, %p456_p9 }
  0xf1   : > { %p454_p8 = pneg %p453_p7 }
  0xf3   : > { %p459_p12 = pnand %p458_p11, %p454_p8 }
  0xf5   : > { %462 = shalt.err (!%p459_p12)
}
  0xf6   : > { %386 = dma.vmem_to_hbm [thread:$0]  (%p565_p5), %s308_s10, 128, %s612_s19, %s294_s20  }
  0xf7 PF: > { %p392_p13 = scmp.ge.s32.totalorder %s497_s15, 2  ;;  %s319_s6 = sand.u32 1, %s485_s12  }
  0xf8   : > { %s320_s7 = scalar_lea.sflag [#allocation3], %s319_s6 }
  0xf9   : > { %p389_p0 = pnand %p392_p13, %p569_p6 }
  0xfb   : > { %p390_p1 = pneg %p389_p0 }
  0xfd   : > { %480 = dma.done.wait (%p390_p1), %s320_s7, 128  }
  0xfe   : > { %482 = vsyncadd (%p390_p1), %s320_s7, 4294967168  ;;  %p13_p2 = scmp.ge.s32.totalorder %s552_s18, 4   ;;  %s653_s12 = smov %s489_s13 }
  0xff   : > { %s654_s13 = smov %s493_s14  ;;  %s655_s14 = smov %s563_s21 }
 0x100   : > { %s656_s15 = smov %s552_s18  ;;  %15 = sbr.rel (!%p13_p2) target bundleno = 3 (0x3), region = 67 }
 0x105   :  { %325 = vsyncpa [#allocation3], 1 }
 0x106   :  { %327 = vsyncpa [#allocation3 + $0x1], 1 }

</bundles_post_ra>
